<compile_context>
chip_gen: v7x
topology: tpu7x:2x2x1
jax: 0.10.0
libtpu: 0.0.40
codegen_flags: <defaults>
</compile_context>

<pallas_src>
import functools

import jax
import jax.numpy as jnp
from jax.experimental import pallas as pl
from jax.experimental.pallas import tpu as pltpu


def _lipcos_robust_acc_kernel(thr_sq_ref, pred_ref, tgt_ref, out_ref, *,
                              true_b, tile_b, has_padding):
    # thr_sq_ref: (1,)        float32 in SMEM (sign-adjusted squared threshold)
    # pred_ref  : (TB, C)     native dtype in VMEM
    # tgt_ref   : (TB, 1)     int32 in VMEM
    # out_ref   : (1, 1)      float32 in VMEM, resident across the grid (accumulator)
    i = pl.program_id(0)

    @pl.when(i == 0)
    def _init():
        out_ref[...] = jnp.zeros_like(out_ref)

    x = pred_ref[...].astype(jnp.float32)                 # cast once per tile
    tb, c = x.shape

    # Top-1 class index (first occurrence on ties, matching torch.topk/argmax).
    col_ids = jax.lax.broadcasted_iota(jnp.int32, (tb, c), 1)
    max_val = jnp.max(x, axis=1, keepdims=True)           # (TB, 1)
    pred_idx = jnp.min(jnp.where(x == max_val, col_ids, jnp.int32(c)),
                       axis=1, keepdims=True)             # (TB, 1)
    correct = pred_idx == tgt_ref[...]                    # (TB, 1) bool

    # ||x||_2 > thr  <=>  sum(x^2) > thr_sq  (thr_sq is -1 if thr < 0 -> always true)
    sum_sq = jnp.sum(x * x, axis=1, keepdims=True)        # (TB, 1)
    robust = sum_sq > thr_sq_ref[0]                       # (TB, 1) bool

    hit = jnp.logical_and(correct, robust)
    if has_padding:
        # Mask rows past the true batch size (padded last tile only exists when
        # B % tile_b != 0); skip this work entirely for evenly divisible batches.
        row_ids = i * tile_b + jax.lax.broadcasted_iota(jnp.int32, (tb, 1), 0)
        hit = jnp.logical_and(hit, row_ids < true_b)

    out_ref[...] += jnp.sum(hit.astype(jnp.float32), axis=(0, 1), keepdims=True)

    @pl.when(i == pl.num_programs(0) - 1)
    def _finalize():
        out_ref[...] = out_ref[...] * jnp.float32(100.0 / true_b)


def lipcos_robust_accuracy(prediction, target, robust_threshold, *, tile_b=None):
    """prediction: (B, C) float (any fp dtype); target: (B,) int; returns scalar f32."""
    B, C = prediction.shape
    itemsize = jnp.dtype(prediction.dtype).itemsize

    if tile_b is None:
        # ~4 MiB per input buffer (x2 for double buffering): safe on v7x (64 MiB
        # VMEM), large enough to approach the HBM roofline on v5e/v6e.
        target_bytes = 4 * 1024 * 1024
        tile_b = int(max(8, min(1024, target_bytes // max(C * itemsize, 1))))
        tile_b = (tile_b // 8) * 8
    if tile_b >= B:
        tile_b = B            # single full-extent block; no alignment constraint
    else:
        tile_b = max(8, (tile_b // 8) * 8)   # sublane-aligned when actually tiling
    num_tiles = (B + tile_b - 1) // tile_b
    has_padding = (B % tile_b) != 0

    tgt = target.astype(jnp.int32).reshape(B, 1)

    # Sign-safe squared threshold: norms are >= 0, so a negative threshold is
    # always exceeded -> use -1.0 sentinel (sum_sq >= 0 > -1 is always True).
    thr = jnp.asarray(robust_threshold, dtype=jnp.float32)
    thr_sq = jnp.where(thr >= 0, thr * thr, jnp.float32(-1.0)).reshape(1)

    kernel = functools.partial(_lipcos_robust_acc_kernel,
                               true_b=B, tile_b=tile_b, has_padding=has_padding)

    cost = pl.CostEstimate(
        flops=6 * B * C,                                  # square/sum/max/select (rough)
        transcendentals=0,
        bytes_accessed=B * C * itemsize + B * 4 + 4 + 4,
    )

    out = pl.pallas_call(
        kernel,
        out_shape=jax.ShapeDtypeStruct((1, 1), jnp.float32),
        grid=(num_tiles,),
        in_specs=[
            pl.BlockSpec(memory_space=pltpu.MemorySpace.SMEM),     # thr_sq scalar
            pl.BlockSpec((tile_b, C), lambda i: (i, 0)),           # prediction tile
            pl.BlockSpec((tile_b, 1), lambda i: (i, 0)),           # target tile
        ],
        out_specs=pl.BlockSpec((1, 1), lambda i: (0, 0)),          # resident accumulator
        compiler_params=pltpu.CompilerParams(
            dimension_semantics=("arbitrary",)),                   # carries accumulator
        cost_estimate=cost,
    )(thr_sq, prediction, tgt)
    return out[0, 0]


def _reference(prediction, target, robust_threshold):
    pred_idx = jnp.argmax(prediction, axis=1)
    correct = pred_idx == target
    robust = jnp.linalg.norm(prediction.astype(jnp.float32), axis=1) > robust_threshold
    return (jnp.sum((correct & robust).astype(jnp.float32))
            * (100.0 / prediction.shape[0]))


if __name__ == "__main__":
    key = jax.random.PRNGKey(0)
    k1, k2, k3, k4 = jax.random.split(key, 4)

    # Deterministic stand-in for lipcosloss.robust_threshold (no checkpoint load).
    robust_threshold = 1.0

    # Case 1: small single-tile shapes consistent with (batch, num_classes).
    B1, C1 = 8, 16
    pred1 = jax.random.normal(k1, (B1, C1), dtype=jnp.float32)
    tgt1 = jax.random.randint(k2, (B1,), 0, C1, dtype=jnp.int32)
    out1 = jax.block_until_ready(lipcos_robust_accuracy(pred1, tgt1, robust_threshold))
    ref1 = _reference(pred1, tgt1, robust_threshold)
    assert jnp.allclose(out1, ref1, atol=1e-5), (out1, ref1)

    # Case 2: multi-tile grid with a padded last tile (exercises masking + accumulation).
    B2, C2 = 40, 16
    pred2 = jax.random.normal(k3, (B2, C2), dtype=jnp.float32)
    tgt2 = jax.random.randint(k4, (B2,), 0, C2, dtype=jnp.int32)
    out2 = jax.block_until_ready(
        lipcos_robust_accuracy(pred2, tgt2, robust_threshold, tile_b=16))
    ref2 = _reference(pred2, tgt2, robust_threshold)
    assert jnp.allclose(out2, ref2, atol=1e-5), (out2, ref2)

    # Case 3: evenly divisible multi-tile grid (padding-free fast path).
    B3, C3 = 64, 16
    pred3 = jax.random.normal(k1, (B3, C3), dtype=jnp.bfloat16)
    tgt3 = jax.random.randint(k2, (B3,), 0, C3, dtype=jnp.int32)
    out3 = jax.block_until_ready(
        lipcos_robust_accuracy(pred3, tgt3, robust_threshold, tile_b=16))
    ref3 = _reference(pred3, tgt3, robust_threshold)
    assert jnp.allclose(out3, ref3, atol=1e-3), (out3, ref3)

    print("KERNEL_OK")
</pallas_src>

<mosaic_0001>
module attributes {stable_mosaic.version = 11 : i64} {
  func.func @_lipcos_robust_acc_kernel(%arg0: i32, %arg1: memref<1xf32, #tpu.memory_space<smem>>, %arg2: memref<8x16xf32, #tpu.memory_space<vmem>>, %arg3: memref<8x1xi32, #tpu.memory_space<vmem>>, %arg4: memref<1x1xf32, #tpu.memory_space<vmem>>) attributes {dimension_semantics = [#tpu.dimension_semantics<arbitrary>], iteration_bounds = array<i64: 1>, scalar_prefetch = 0 : i64, scratch_operands = 0 : i64, tpu.core_type = #tpu.core_type<tc>, window_params = [{transform_indices = @transform_0, window_bounds = array<i64: 1>}, {transform_indices = @transform_1, window_bounds = array<i64: 8, 16>}, {transform_indices = @transform_2, window_bounds = array<i64: 8, 1>}, {pipeline_mode = #tpu.pipeline_mode<synchronous>, transform_indices = @transform_3, window_bounds = array<i64: 1, 1>}]} {
    %c0_i32 = arith.constant 0 : i32
    %0 = arith.cmpi eq, %arg0, %c0_i32 : i32
    %1 = arith.extui %0 : i1 to i32
    %c0_i32_0 = arith.constant 0 : i32
    %2 = arith.cmpi ne, %1, %c0_i32_0 : i32
    scf.if %2 {
      %cst_14 = arith.constant 0.000000e+00 : f32
      %35 = vector.broadcast %cst_14 : f32 to vector<1x1xf32>
      %c0_15 = arith.constant 0 : index
      %c0_16 = arith.constant 0 : index
      %36 = vector.load %arg4[%c0_15, %c0_16] : memref<1x1xf32, #tpu.memory_space<vmem>>, vector<1x1xf32>
      tpu.vector_store %arg4[%c0_15, %c0_16], %35 {strides = array<i32>} : memref<1x1xf32, #tpu.memory_space<vmem>>, vector<1x1xf32>,
    } else {
    }
    %c0 = arith.constant 0 : index
    %c0_1 = arith.constant 0 : index
    %3 = vector.load %arg2[%c0, %c0_1] : memref<8x16xf32, #tpu.memory_space<vmem>>, vector<8x16xf32>
    %4 = tpu.iota {dimensions = array<i32: 1>} : vector<8x16xi32>
    %cst = arith.constant dense<0xFF800000> : vector<8xf32>
    %5 = vector.multi_reduction <maximumf>, %3, %cst [1] : vector<8x16xf32> to vector<8xf32>
    %6 = vector.shape_cast %5 : vector<8xf32> to vector<8x1xf32>
    %7 = vector.broadcast %6 : vector<8x1xf32> to vector<8x16xf32>
    %8 = arith.cmpf oeq, %3, %7 : vector<8x16xf32>
    %c16_i32 = arith.constant 16 : i32
    %9 = vector.broadcast %c16_i32 : i32 to vector<8x16xi32>
    %10 = arith.select %8, %4, %9 : vector<8x16xi1>, vector<8x16xi32>
    %cst_2 = arith.constant dense<2147483647> : vector<8xi32>
    %11 = vector.multi_reduction <minsi>, %10, %cst_2 [1] : vector<8x16xi32> to vector<8xi32>
    %12 = vector.shape_cast %11 : vector<8xi32> to vector<8x1xi32>
    %c0_3 = arith.constant 0 : index
    %c0_4 = arith.constant 0 : index
    %13 = vector.load %arg3[%c0_3, %c0_4] : memref<8x1xi32, #tpu.memory_space<vmem>>, vector<8x1xi32>
    %14 = arith.cmpi eq, %12, %13 : vector<8x1xi32>
    %15 = arith.mulf %3, %3 : vector<8x16xf32>
    %cst_5 = arith.constant dense<0.000000e+00> : vector<8xf32>
    %16 = vector.multi_reduction <add>, %15, %cst_5 [1] : vector<8x16xf32> to vector<8xf32>
    %17 = vector.shape_cast %16 : vector<8xf32> to vector<8x1xf32>
    %c0_6 = arith.constant 0 : index
    %18 = memref.load %arg1[%c0_6] : memref<1xf32, #tpu.memory_space<smem>>
    %19 = vector.broadcast %18 : f32 to vector<8x1xf32>
    %20 = arith.cmpf ogt, %17, %19 : vector<8x1xf32>
    %21 = arith.andi %14, %20 : vector<8x1xi1>
    %c0_7 = arith.constant 0 : index
    %c0_8 = arith.constant 0 : index
    %22 = vector.load %arg4[%c0_7, %c0_8] : memref<1x1xf32, #tpu.memory_space<vmem>>, vector<1x1xf32>
    %23 = arith.extui %21 : vector<8x1xi1> to vector<8x1xi32>
    %24 = arith.sitofp %23 : vector<8x1xi32> to vector<8x1xf32>
    %25 = vector.shape_cast %24 : vector<8x1xf32> to vector<1x8x1xf32>
    %cst_9 = arith.constant dense<0.000000e+00> : vector<1xf32>
    %26 = vector.multi_reduction <add>, %25, %cst_9 [1, 2] : vector<1x8x1xf32> to vector<1xf32>
    %27 = vector.shape_cast %26 : vector<1xf32> to vector<1x1x1xf32>
    %28 = vector.extract %27[0, 0, 0] : f32 from vector<1x1x1xf32>
    %29 = vector.broadcast %28 : f32 to vector<1x1xf32>
    %30 = arith.addf %22, %29 : vector<1x1xf32>
    %c0_10 = arith.constant 0 : index
    %c0_11 = arith.constant 0 : index
    %31 = vector.load %arg4[%c0_10, %c0_11] : memref<1x1xf32, #tpu.memory_space<vmem>>, vector<1x1xf32>
    tpu.vector_store %arg4[%c0_10, %c0_11], %30 {strides = array<i32>} : memref<1x1xf32, #tpu.memory_space<vmem>>, vector<1x1xf32>,
    %c0_i32_12 = arith.constant 0 : i32
    %32 = arith.cmpi eq, %arg0, %c0_i32_12 : i32
    %33 = arith.extui %32 : i1 to i32
    %c0_i32_13 = arith.constant 0 : i32
    %34 = arith.cmpi ne, %33, %c0_i32_13 : i32
    scf.if %34 {
      %c0_14 = arith.constant 0 : index
      %c0_15 = arith.constant 0 : index
      %35 = vector.load %arg4[%c0_14, %c0_15] : memref<1x1xf32, #tpu.memory_space<vmem>>, vector<1x1xf32>
      %cst_16 = arith.constant 1.250000e+01 : f32
      %36 = vector.broadcast %cst_16 : f32 to vector<1x1xf32>
      %37 = arith.mulf %35, %36 : vector<1x1xf32>
      %c0_17 = arith.constant 0 : index
      %c0_18 = arith.constant 0 : index
      %38 = vector.load %arg4[%c0_17, %c0_18] : memref<1x1xf32, #tpu.memory_space<vmem>>, vector<1x1xf32>
      tpu.vector_store %arg4[%c0_17, %c0_18], %37 {strides = array<i32>} : memref<1x1xf32, #tpu.memory_space<vmem>>, vector<1x1xf32>,
    } else {
    }
    return
  }
  func.func @transform_0(%arg0: i32) -> i32 {
    %c0_i32 = arith.constant 0 : i32
    %c0_i32_0 = arith.constant 0 : i32
    return %c0_i32 : i32
  }
  func.func @transform_1(%arg0: i32) -> (i32, i32) {
    %c0_i32 = arith.constant 0 : i32
    %c0_i32_0 = arith.constant 0 : i32
    return %arg0, %c0_i32 : i32, i32
  }
  func.func @transform_2(%arg0: i32) -> (i32, i32) {
    %c0_i32 = arith.constant 0 : i32
    %c0_i32_0 = arith.constant 0 : i32
    return %arg0, %c0_i32 : i32, i32
  }
  func.func @transform_3(%arg0: i32) -> (i32, i32) {
    %c0_i32 = arith.constant 0 : i32
    %c0_i32_0 = arith.constant 0 : i32
    %c0_i32_1 = arith.constant 0 : i32
    return %c0_i32, %c0_i32_0 : i32, i32
  }
}

</mosaic_0001>

<bundles_post_ra>
// kernel: tpu_custom_call.1
= control target key start
LH: loop header
LB: loop body
LE: loop exit
PB: predicated region body
PF: predicated region fallthrough
CT: control target
= control target key end

     0   :  { %vm25_vm0 = vcmask 130048   ;;  %s172_s0 = inlined_call_operand.<no memory space> [shape: f32[1], index: 0, kind: input, shape index: {}]   ;;  %s173_s1 = inlined_call_operand.vmem [shape: f32[8,16], index: 1, kind: input, shape index: {}]   ;;  %s174_s2 = inlined_call_operand.vmem [shape: s32[8,1], index: 2, kind: input, shape index: {}]   ;;  %s175_s3 = inlined_call_operand.hbm [shape: f32[1,1], index: 3, kind: output, shape index: {}]  }
   0x1   :  { %v22_v0 = vld [vmem:[%s173_s1] sm:$0xff] }
   0x2   :  { %9 = vsyncpa [#allocation4], 0  ;;  %v26_v1 = vsel %vm25_vm0, %v22_v0, -inf  ;;  %v23_v2 = vlaneseq  ;;  %v48_v12 = vmul.f32 %v22_v0, %v22_v0  ;;  %vm20_vm3 = vcmask 0   ;;  %v46_v20 = vld [vmem:[%s174_s2] sm:$0xff] }
   0x3   :  { %27 = vmax.xlane.f32.xlu0 %v26_v1  ;;  %v123_v15 = vmov 0.0   ;;  %v53_v21 = vstv %s172_s0  ;;  %vm59_vm6 = vcmask 7168   ;;  %s124_s0 = smov [#allocation3]  }
   0x4   :  { %v24_v3 = vand.u32 127, %v23_v2  ;;  %v49_v14 = vsel %vm25_vm0, %v48_v12, 0.0  ;;  %21 = vst.msk [vmem:[#allocation3] sm:$0x1] %vm20_vm3, %v123_v15  ;;  %s86_s17 = sshll.u32 %s124_s0, 4  ;;  %s87_s17 = int_to_ptr.vmem [resolvable:$true] %s86_s17 }
   0x5   :  { %s99_s18 = scalar_lea.vmem %s87_s17, 16  ;;  %s103_s19 = scalar_lea.vmem %s87_s17, 32 }
   0x6   :  { %p100_p0 = scmp.ne.s32.totalorder %s87_s17, %s99_s18  ;;  %p104_p1 = scmp.lt.s32.totalorder %s87_s17, %s87_s17 }
   0x7   :  { %p105_p2 = scmp.lt.s32.totalorder %s103_s19, %s99_s18 }
   0x9   :  { %p106_p3 = por %p105_p2, %p104_p1 }
   0xb   :  { %v56_v33 = vld [vmem:[#allocation3] sm:$0x1]  ;;  %p107_p4 = pnand %p106_p3, %p100_p0 }
  0x90   :  { %v28_v4 = vpop.xlane.xlu0 %27 }
  0x91   :  { %vm29_vm1 = vcmp.eq.f32.partialorder %v22_v0, %v28_v4 }
  0x92   :  { %v30_v5 = vsel %vm29_vm1, %v24_v3, 16 }
  0x93   :  { %v31_v6 = vsel %vm25_vm0, %v30_v5, 2147483647 }
  0x94   :  { %v33_v7 = vshra.s32 %v31_v6, 16  ;;  %v32_v9 = vand.u32 65535, %v31_v6 }
  0x96   :  { %v35_v8 = vcvt.s32.f32 %v33_v7  ;;  %v34_v11 = vcvt.s32.f32 %v32_v9 }
  0x98   :  { %36 = vmin.xlane.f32.xlu0 %v35_v8 }
 0x125   :  { %v37_v10 = vpop.xlane.xlu0 %36 }
 0x126   :  { %vm38_vm2 = vcmp.eq.f32.partialorder %v35_v8, %v37_v10  ;;  %v43_v16 = vcvt.f32.s32 %v37_v10 }
 0x127   :  { %v39_v13 = vsel %vm38_vm2, %v34_v11, inf }
 0x128   :  { %40 = vmin.xlane.f32.xlu1 %v39_v13  ;;  %v44_v18 = vshll.u32 %v43_v16, 16 }
 0x12c   :  { %50 = vadd.xlane.f32.xlu1 %v49_v14 }
 0x1b5   :  { %v41_v17 = vpop.xlane.xlu1 %40 }
 0x1b6   :  { %v42_v19 = vcvt.f32.s32 %v41_v17 }
 0x1b8   :  { %v45_v22 = vadd.s32 %v44_v18, %v42_v19 }
 0x1b9   :  { %v51_v23 = vpop.xlane.xlu1 %50 }
 0x1ba   :  { %vm47_vm4 = vcmp.eq.s32.totalorder %v45_v22, %v46_v20  ;;  %vm54_vm5 = vcmp.gt.f32.partialorder %v51_v23, %v53_v21 }
 0x1bb   :  { %vm55_vm7 = vmand %vm47_vm4, %vm54_vm5 }
 0x1bc   :  { %v94_v24 = vsel %vm55_vm7, 1.0, %v123_v15 }
 0x1bd   :  { %v60_v25 = vsel %vm59_vm6, %v94_v24, 0.0 }
 0x1be   :  { %61 = vadd.xlane.f32.xlu0 %v60_v25 }
 0x24b   :  { %v62_v26 = vpop.xlane.xlu0 %61 }
 0x24c   :  { %v63_v27 = vrot.slane %v62_v26, 4 }
 0x24e   :  { %v64_v28 = vadd.f32 %v63_v27, %v62_v26 }
 0x250   :  { %v65_v29 = vrot.slane %v64_v28, 2 }
 0x252   :  { %v66_v30 = vadd.f32 %v65_v29, %v64_v28 }
 0x254   :  { %v67_v31 = vrot.slane %v66_v30, 1 }
 0x256   :  { %v68_v32 = vadd.f32 %v67_v31, %v66_v30 }
 0x258   :  { %95 = vpush %v68_v32 }
 0x289   :  { %s96_s2 = spop %95 }
 0x28a   :  { %v70_v34 = vstv %s96_s2 }
 0x28b   :  { %v71_v35 = vadd.f32 %v70_v34, %v56_v33 }
 0x28d   :  { %73 = vst.msk [vmem:[#allocation3] sm:$0x1] %vm20_vm3, %v71_v35 }
 0x294   :  { %v77_v36 = vld [vmem:[#allocation3] sm:$0x1] }
 0x295   :  { %v78_v37 = vmul.f32 12.5, %v77_v36 }
 0x297   :  { %79 = vst.msk [vmem:[#allocation3] sm:$0x1] %vm20_vm3, %v78_v37 }
 0x298   :  { %110 = shalt.err (!%p107_p4)
}
 0x299   :  { %s111_s22 = scalar_lea.hbm %s175_s3, 16 }
 0x29a   :  { %p112_p5 = scmp.ne.s32.totalorder %s175_s3, %s111_s22  ;;  %p115_p6 = scmp.lt.u32.totalorder %s111_s22, %s175_s3 }
 0x29c   :  { %p117_p7 = pnand %p115_p6, %p112_p5 }
 0x29e   :  { %120 = shalt.err (!%p117_p7)
}
 0x29f   :  { %89 = dma.vmem_to_hbm [thread:$0]  %s87_s17, 16, %s175_s3, [#allocation4]  }
 0x2a0   :  { %121 = dma.done.wait [#allocation4], 16  }
 0x2a1   :  { %122 = vsyncadd [#allocation4], 4294967280 }
 0x2a2   :  { %93 = vsyncpa [#allocation4], 1 }

</bundles_post_ra>
